<compile_context>
chip_gen: v5e
topology: v5e:2x2
jax: 0.10.0
libtpu: 0.0.40
codegen_flags: <defaults>
</compile_context>

<pallas_src>
import functools
import re

import jax
import jax.numpy as jnp
from jax.experimental import pallas as pl
from jax.experimental.pallas import tpu as pltpu


def _round_up(x: int, m: int) -> int:
    return ((x + m - 1) // m) * m


def _tpu_generation() -> int:
    """Best-effort TPU generation (5/6/7...); 0 if unknown (falls back to safe f32 path)."""
    try:
        kind = jax.devices()[0].device_kind
    except Exception:  # pragma: no cover
        return 0
    if "tpu" not in kind.lower():
        return 0
    m = re.search(r"(\d+)", kind)
    return int(m.group(1)) if m else 0


def _scatter_max_kernel(order_ref, feat_ref, out_ref, acc_ref, *,
                        num_segments_padded, init_val):
    """Running segmented max over node tiles.

    order_ref: (TILE_N, 1)       int32    segment id per node (-1 for padding rows)
    feat_ref:  (TILE_N, TILE_D)  feat dtype
    out_ref:   (S_pad, TILE_D)   feat dtype (written once, at the last node step)
    acc_ref:   (S_pad, TILE_D)   acc dtype VMEM accumulator (persists across node steps)
    """
    ni = pl.program_id(1)  # node-tile index (reduction axis, last grid dim)

    @pl.when(ni == 0)
    def _init():
        acc_ref[...] = jnp.full(acc_ref.shape, init_val, dtype=acc_ref.dtype)

    order = order_ref[...]                        # (TILE_N, 1)
    feat = feat_ref[...].astype(acc_ref.dtype)    # no-op on v6e/v7x bf16 and on f32

    # Per-segment masked max, committed row-by-row into the VMEM accumulator so only
    # one (1, TILE_D) partial is live at a time (no rows-list + concatenate relayout).
    # TODO(synk): for num_segments >> 16, pre-sort nodes by segment in the wrapper and
    # scalar-prefetch per-segment offsets (PrefetchScalarGridSpec num_scalar_prefetch>=1)
    # so the masked O(S*N*D) VALU work drops to O(N*D).
    for s in range(num_segments_padded):
        row = jnp.max(jnp.where(order == s, feat, init_val), axis=0, keepdims=True)
        acc_ref[s:s + 1, :] = jnp.maximum(acc_ref[s:s + 1, :], row)

    @pl.when(ni == pl.num_programs(1) - 1)
    def _finalize():
        out_ref[...] = acc_ref[...].astype(out_ref.dtype)


def scatter_max_pallas(
    feat: jax.Array,
    order: jax.Array,
    num_segments: int,
    *,
    tile_n: int = 1024,
    tile_d: int = 512,
) -> jax.Array:
    """Pallas equivalent of torch_scatter.scatter_max(feat, order, dim=0)[0]."""
    n, d = feat.shape
    num_segments = int(num_segments)
    assert num_segments >= 1, "num_segments must be >= 1"
    assert order.shape == (n,), "order must be [num_nodes]"

    gen = _tpu_generation()

    # ---- accumulator dtype policy (max is exact in bf16; v5e has no bf16 VPU) -------
    if jnp.issubdtype(feat.dtype, jnp.integer):
        acc_dtype = feat.dtype if jnp.dtype(feat.dtype).itemsize >= 4 else jnp.int32
        init_val = int(jnp.iinfo(acc_dtype).min)
    elif feat.dtype == jnp.bfloat16 and gen >= 6:
        acc_dtype = jnp.bfloat16           # bf16-native VPU on v6e/v7x
        init_val = float("-inf")
    else:
        acc_dtype = jnp.float32            # f32 inputs, or bf16 on v5e/unknown
        init_val = float("-inf")

    # ---- lane-dense feature tiling (the "parallel" axis) ----------------------------
    d128 = _round_up(d, 128)
    d_tile = min(_round_up(tile_d, 128), d128)
    # v7x megacore: the feature axis is the only parallel axis; make sure both
    # TensorCores get work whenever the feature dim allows it.
    if gen >= 7 and d128 >= 256 and d128 // d_tile < 2:
        d_tile = _round_up(d128 // 2, 128)
    d_pad = _round_up(d128, d_tile)

    # ---- node tiling (reduction axis, streamed/pipelined) ---------------------------
    s_pad = _round_up(num_segments, 8)
    n8 = _round_up(n, 8)
    n_tile = min(_round_up(tile_n, 8), n8)

    # ---- generation-aware VMEM budget (2x double-buffered inputs + acc + out) -------
    itemsize = jnp.dtype(feat.dtype).itemsize
    acc_itemsize = jnp.dtype(acc_dtype).itemsize
    vmem_ceiling = (48 << 20) if gen >= 7 else (100 << 20)   # v7x: 64 MiB physical VMEM

    def _vmem_bytes(nt: int) -> int:
        feat_buf = nt * d_tile * itemsize
        order_buf = nt * 128 * 4           # (nt, 1) int32 block lane-pads to 128 lanes
        fixed = s_pad * d_tile * (acc_itemsize + 2 * itemsize)   # acc + out buffers
        return 2 * feat_buf + 2 * order_buf + fixed + (2 << 20)

    while _vmem_bytes(n_tile) > vmem_ceiling and n_tile > 8:
        n_tile = max(8, _round_up(n_tile // 2, 8))
    n_pad = _round_up(n8, n_tile)
    vmem_limit = int(min(vmem_ceiling, max(_vmem_bytes(n_tile), 32 << 20)))

    # ---- pad inputs so every block is full (padding rows: segment id -1 -> ignored) --
    feat_p = jnp.pad(feat, ((0, n_pad - n), (0, d_pad - d)))
    # TODO(synk): int8/int16 segment ids would shrink this lane-padded side-band ~4x.
    order_p = jnp.pad(
        order.reshape(n, 1).astype(jnp.int32),
        ((0, n_pad - n), (0, 0)),
        constant_values=-1,
    )

    grid = (d_pad // d_tile, n_pad // n_tile)   # (parallel feature, reduction node)

    kernel = functools.partial(
        _scatter_max_kernel, num_segments_padded=s_pad, init_val=init_val
    )
    out_padded = pl.pallas_call(
        kernel,
        out_shape=jax.ShapeDtypeStruct((s_pad, d_pad), feat.dtype),
        grid_spec=pltpu.PrefetchScalarGridSpec(
            num_scalar_prefetch=0,
            grid=grid,
            in_specs=[
                pl.BlockSpec((n_tile, 1), lambda di, ni: (ni, 0)),
                # TODO(synk): on v7x, sweep pipeline_mode=pl.Buffered(3) here once the
                # kernel is fully HBM-bound.
                pl.BlockSpec((n_tile, d_tile), lambda di, ni: (ni, di)),
            ],
            out_specs=pl.BlockSpec((s_pad, d_tile), lambda di, ni: (0, di)),
            scratch_shapes=[pltpu.VMEM((s_pad, d_tile), acc_dtype)],
        ),
        compiler_params=pltpu.CompilerParams(
            dimension_semantics=("parallel", "arbitrary"),
            vmem_limit_bytes=vmem_limit,
        ),
    )(order_p, feat_p)

    out = out_padded[:num_segments, :d]
    # torch_scatter.scatter_max fills never-touched segments with 0. A per-segment node
    # count (instead of a sentinel-equality test) keeps -inf / finfo.min features exact.
    counts = (
        jnp.zeros((num_segments,), jnp.int32)
        .at[order.astype(jnp.int32)]
        .add(1, mode="drop")
    )
    return jnp.where(counts[:, None] > 0, out, jnp.zeros((), feat.dtype))


class GraphAggregator:
    """JAX/Pallas port of the PyTorch GraphAggregator module (scatter_max operator)."""

    allowed_operators = ("scatter_max",)

    def __init__(self, operator: str):
        assert operator in self.allowed_operators, (
            f"Invalid graph aggregator: {operator}, not in {self.allowed_operators}"
        )
        self.operator = operator

    def forward(self, feat: jax.Array, order: jax.Array,
                num_segments: int | None = None) -> jax.Array:
        # Prefer a statically supplied num_segments (avoids device->host sync and
        # per-segment-count retracing). Fallback mirrors torch_scatter's
        # dim_size = order.max() + 1 default.
        if num_segments is None:
            num_segments = int(jax.device_get(order).max()) + 1
        return scatter_max_pallas(feat, order, num_segments)

    __call__ = forward


if __name__ == "__main__":
    key = jax.random.PRNGKey(0)
    agg = GraphAggregator("scatter_max")

    # Case 1: small f32 graph, dense segment ids (num_segments = max(order)+1 = 3).
    num_nodes, feat_dim = 8, 32
    feat = jax.random.normal(key, (num_nodes, feat_dim), dtype=jnp.float32)
    order = jnp.array([0, 0, 1, 1, 1, 2, 2, 2], dtype=jnp.int32)  # 3 subgraphs
    out = jax.block_until_ready(agg(feat, order, num_segments=3))
    ref = jax.ops.segment_max(feat, order, num_segments=3)
    assert out.shape == (3, feat_dim)
    assert jnp.allclose(out, ref), "Pallas scatter_max mismatch vs. reference"

    # Case 2: trailing empty segments -> torch_scatter semantics fill them with 0.
    out5 = jax.block_until_ready(agg(feat, order, num_segments=5))
    assert out5.shape == (5, feat_dim)
    assert jnp.allclose(out5[:3], ref), "non-empty segment mismatch"
    assert jnp.allclose(out5[3:], jnp.zeros((2, feat_dim), feat.dtype)), \
        "empty segments must be 0"

    # Case 3: bf16 path (bf16-native accumulate on v6e/v7x) + multi node-tile stream.
    k1, k2 = jax.random.split(key)
    n3, d3, s3 = 1200, 256, 6
    feat3 = jax.random.normal(k1, (n3, d3), dtype=jnp.bfloat16)
    order3 = jnp.concatenate([
        jnp.arange(s3, dtype=jnp.int32),
        jax.random.randint(k2, (n3 - s3,), 0, s3, dtype=jnp.int32),
    ])
    out3 = jax.block_until_ready(agg(feat3, order3, num_segments=s3))
    ref3 = jax.ops.segment_max(feat3, order3, num_segments=s3)
    assert out3.shape == (s3, d3)
    assert jnp.array_equal(out3, ref3), "bf16 scatter_max mismatch vs. reference"

    print("KERNEL_OK")
</pallas_src>

<mosaic_0001>
module attributes {stable_mosaic.version = 11 : i64} {
  func.func @_scatter_max_kernel(%arg0: i32, %arg1: i32, %arg2: memref<8x1xi32, #tpu.memory_space<vmem>>, %arg3: memref<8x128xf32, #tpu.memory_space<vmem>>, %arg4: memref<8x128xf32, #tpu.memory_space<vmem>>, %arg5: memref<8x128xf32, #tpu.memory_space<vmem>>) attributes {dimension_semantics = [#tpu.dimension_semantics<parallel>, #tpu.dimension_semantics<arbitrary>], iteration_bounds = array<i64: 1, 1>, scalar_prefetch = 0 : i64, scratch_operands = 1 : i64, tpu.core_type = #tpu.core_type<tc>, window_params = [{transform_indices = @transform_0, window_bounds = array<i64: 8, 1>}, {transform_indices = @transform_1, window_bounds = array<i64: 8, 128>}, {transform_indices = @transform_2, window_bounds = array<i64: 8, 128>}]} {
    %c0_i32 = arith.constant 0 : i32
    %0 = arith.cmpi eq, %arg1, %c0_i32 : i32
    %1 = arith.extui %0 : i1 to i32
    %c0_i32_0 = arith.constant 0 : i32
    %2 = arith.cmpi ne, %1, %c0_i32_0 : i32
    scf.if %2 {
      %cst_47 = arith.constant 0xFF800000 : f32
      %96 = vector.broadcast %cst_47 : f32 to vector<8x128xf32>
      %c0_48 = arith.constant 0 : index
      %c0_49 = arith.constant 0 : index
      %97 = vector.load %arg5[%c0_48, %c0_49] : memref<8x128xf32, #tpu.memory_space<vmem>>, vector<8x128xf32>
      tpu.vector_store %arg5[%c0_48, %c0_49], %96 {strides = array<i32>} : memref<8x128xf32, #tpu.memory_space<vmem>>, vector<8x128xf32>,
    } else {
    }
    %c0 = arith.constant 0 : index
    %c0_1 = arith.constant 0 : index
    %3 = vector.load %arg2[%c0, %c0_1] : memref<8x1xi32, #tpu.memory_space<vmem>>, vector<8x1xi32>
    %c0_2 = arith.constant 0 : index
    %c0_3 = arith.constant 0 : index
    %4 = vector.load %arg3[%c0_2, %c0_3] : memref<8x128xf32, #tpu.memory_space<vmem>>, vector<8x128xf32>
    %c0_i32_4 = arith.constant 0 : i32
    %5 = vector.broadcast %c0_i32_4 : i32 to vector<8x1xi32>
    %6 = arith.cmpi eq, %3, %5 : vector<8x1xi32>
    %cst = arith.constant 0xFF800000 : f32
    %7 = vector.shape_cast %6 : vector<8x1xi1> to vector<8x1xi1>
    %8 = vector.broadcast %7 : vector<8x1xi1> to vector<8x128xi1>
    %9 = vector.broadcast %cst : f32 to vector<8x128xf32>
    %10 = arith.select %8, %4, %9 : vector<8x128xi1>, vector<8x128xf32>
    %cst_5 = arith.constant dense<0xFF800000> : vector<128xf32>
    %11 = vector.multi_reduction <maximumf>, %10, %cst_5 [0] : vector<8x128xf32> to vector<128xf32>
    %12 = vector.shape_cast %11 : vector<128xf32> to vector<1x128xf32>
    %c0_6 = arith.constant 0 : index
    %c0_7 = arith.constant 0 : index
    %13 = vector.load %arg5[%c0_6, %c0_7] : memref<8x128xf32, #tpu.memory_space<vmem>>, vector<1x128xf32>
    %14 = arith.maximumf %13, %12 : vector<1x128xf32>
    %c0_8 = arith.constant 0 : index
    %c0_9 = arith.constant 0 : index
    %15 = vector.load %arg5[%c0_8, %c0_9] : memref<8x128xf32, #tpu.memory_space<vmem>>, vector<1x128xf32>
    tpu.vector_store %arg5[%c0_8, %c0_9], %14 {strides = array<i32>} : memref<8x128xf32, #tpu.memory_space<vmem>>, vector<1x128xf32>,
    %c1_i32 = arith.constant 1 : i32
    %16 = vector.broadcast %c1_i32 : i32 to vector<8x1xi32>
    %17 = arith.cmpi eq, %3, %16 : vector<8x1xi32>
    %cst_10 = arith.constant 0xFF800000 : f32
    %18 = vector.shape_cast %17 : vector<8x1xi1> to vector<8x1xi1>
    %19 = vector.broadcast %18 : vector<8x1xi1> to vector<8x128xi1>
    %20 = vector.broadcast %cst_10 : f32 to vector<8x128xf32>
    %21 = arith.select %19, %4, %20 : vector<8x128xi1>, vector<8x128xf32>
    %cst_11 = arith.constant dense<0xFF800000> : vector<128xf32>
    %22 = vector.multi_reduction <maximumf>, %21, %cst_11 [0] : vector<8x128xf32> to vector<128xf32>
    %23 = vector.shape_cast %22 : vector<128xf32> to vector<1x128xf32>
    %c1 = arith.constant 1 : index
    %c0_12 = arith.constant 0 : index
    %24 = vector.load %arg5[%c1, %c0_12] : memref<8x128xf32, #tpu.memory_space<vmem>>, vector<1x128xf32>
    %25 = arith.maximumf %24, %23 : vector<1x128xf32>
    %c1_13 = arith.constant 1 : index
    %c0_14 = arith.constant 0 : index
    %26 = vector.load %arg5[%c1_13, %c0_14] : memref<8x128xf32, #tpu.memory_space<vmem>>, vector<1x128xf32>
    tpu.vector_store %arg5[%c1_13, %c0_14], %25 {strides = array<i32>} : memref<8x128xf32, #tpu.memory_space<vmem>>, vector<1x128xf32>,
    %c2_i32 = arith.constant 2 : i32
    %27 = vector.broadcast %c2_i32 : i32 to vector<8x1xi32>
    %28 = arith.cmpi eq, %3, %27 : vector<8x1xi32>
    %cst_15 = arith.constant 0xFF800000 : f32
    %29 = vector.shape_cast %28 : vector<8x1xi1> to vector<8x1xi1>
    %30 = vector.broadcast %29 : vector<8x1xi1> to vector<8x128xi1>
    %31 = vector.broadcast %cst_15 : f32 to vector<8x128xf32>
    %32 = arith.select %30, %4, %31 : vector<8x128xi1>, vector<8x128xf32>
    %cst_16 = arith.constant dense<0xFF800000> : vector<128xf32>
    %33 = vector.multi_reduction <maximumf>, %32, %cst_16 [0] : vector<8x128xf32> to vector<128xf32>
    %34 = vector.shape_cast %33 : vector<128xf32> to vector<1x128xf32>
    %c2 = arith.constant 2 : index
    %c0_17 = arith.constant 0 : index
    %35 = vector.load %arg5[%c2, %c0_17] : memref<8x128xf32, #tpu.memory_space<vmem>>, vector<1x128xf32>
    %36 = arith.maximumf %35, %34 : vector<1x128xf32>
    %c2_18 = arith.constant 2 : index
    %c0_19 = arith.constant 0 : index
    %37 = vector.load %arg5[%c2_18, %c0_19] : memref<8x128xf32, #tpu.memory_space<vmem>>, vector<1x128xf32>
    tpu.vector_store %arg5[%c2_18, %c0_19], %36 {strides = array<i32>} : memref<8x128xf32, #tpu.memory_space<vmem>>, vector<1x128xf32>,
    %c3_i32 = arith.constant 3 : i32
    %38 = vector.broadcast %c3_i32 : i32 to vector<8x1xi32>
    %39 = arith.cmpi eq, %3, %38 : vector<8x1xi32>
    %cst_20 = arith.constant 0xFF800000 : f32
    %40 = vector.shape_cast %39 : vector<8x1xi1> to vector<8x1xi1>
    %41 = vector.broadcast %40 : vector<8x1xi1> to vector<8x128xi1>
    %42 = vector.broadcast %cst_20 : f32 to vector<8x128xf32>
    %43 = arith.select %41, %4, %42 : vector<8x128xi1>, vector<8x128xf32>
    %cst_21 = arith.constant dense<0xFF800000> : vector<128xf32>
    %44 = vector.multi_reduction <maximumf>, %43, %cst_21 [0] : vector<8x128xf32> to vector<128xf32>
    %45 = vector.shape_cast %44 : vector<128xf32> to vector<1x128xf32>
    %c3 = arith.constant 3 : index
    %c0_22 = arith.constant 0 : index
    %46 = vector.load %arg5[%c3, %c0_22] : memref<8x128xf32, #tpu.memory_space<vmem>>, vector<1x128xf32>
    %47 = arith.maximumf %46, %45 : vector<1x128xf32>
    %c3_23 = arith.constant 3 : index
    %c0_24 = arith.constant 0 : index
    %48 = vector.load %arg5[%c3_23, %c0_24] : memref<8x128xf32, #tpu.memory_space<vmem>>, vector<1x128xf32>
    tpu.vector_store %arg5[%c3_23, %c0_24], %47 {strides = array<i32>} : memref<8x128xf32, #tpu.memory_space<vmem>>, vector<1x128xf32>,
    %c4_i32 = arith.constant 4 : i32
    %49 = vector.broadcast %c4_i32 : i32 to vector<8x1xi32>
    %50 = arith.cmpi eq, %3, %49 : vector<8x1xi32>
    %cst_25 = arith.constant 0xFF800000 : f32
    %51 = vector.shape_cast %50 : vector<8x1xi1> to vector<8x1xi1>
    %52 = vector.broadcast %51 : vector<8x1xi1> to vector<8x128xi1>
    %53 = vector.broadcast %cst_25 : f32 to vector<8x128xf32>
    %54 = arith.select %52, %4, %53 : vector<8x128xi1>, vector<8x128xf32>
    %cst_26 = arith.constant dense<0xFF800000> : vector<128xf32>
    %55 = vector.multi_reduction <maximumf>, %54, %cst_26 [0] : vector<8x128xf32> to vector<128xf32>
    %56 = vector.shape_cast %55 : vector<128xf32> to vector<1x128xf32>
    %c4 = arith.constant 4 : index
    %c0_27 = arith.constant 0 : index
    %57 = vector.load %arg5[%c4, %c0_27] : memref<8x128xf32, #tpu.memory_space<vmem>>, vector<1x128xf32>
    %58 = arith.maximumf %57, %56 : vector<1x128xf32>
    %c4_28 = arith.constant 4 : index
    %c0_29 = arith.constant 0 : index
    %59 = vector.load %arg5[%c4_28, %c0_29] : memref<8x128xf32, #tpu.memory_space<vmem>>, vector<1x128xf32>
    tpu.vector_store %arg5[%c4_28, %c0_29], %58 {strides = array<i32>} : memref<8x128xf32, #tpu.memory_space<vmem>>, vector<1x128xf32>,
    %c5_i32 = arith.constant 5 : i32
    %60 = vector.broadcast %c5_i32 : i32 to vector<8x1xi32>
    %61 = arith.cmpi eq, %3, %60 : vector<8x1xi32>
    %cst_30 = arith.constant 0xFF800000 : f32
    %62 = vector.shape_cast %61 : vector<8x1xi1> to vector<8x1xi1>
    %63 = vector.broadcast %62 : vector<8x1xi1> to vector<8x128xi1>
    %64 = vector.broadcast %cst_30 : f32 to vector<8x128xf32>
    %65 = arith.select %63, %4, %64 : vector<8x128xi1>, vector<8x128xf32>
    %cst_31 = arith.constant dense<0xFF800000> : vector<128xf32>
    %66 = vector.multi_reduction <maximumf>, %65, %cst_31 [0] : vector<8x128xf32> to vector<128xf32>
    %67 = vector.shape_cast %66 : vector<128xf32> to vector<1x128xf32>
    %c5 = arith.constant 5 : index
    %c0_32 = arith.constant 0 : index
    %68 = vector.load %arg5[%c5, %c0_32] : memref<8x128xf32, #tpu.memory_space<vmem>>, vector<1x128xf32>
    %69 = arith.maximumf %68, %67 : vector<1x128xf32>
    %c5_33 = arith.constant 5 : index
    %c0_34 = arith.constant 0 : index
    %70 = vector.load %arg5[%c5_33, %c0_34] : memref<8x128xf32, #tpu.memory_space<vmem>>, vector<1x128xf32>
    tpu.vector_store %arg5[%c5_33, %c0_34], %69 {strides = array<i32>} : memref<8x128xf32, #tpu.memory_space<vmem>>, vector<1x128xf32>,
    %c6_i32 = arith.constant 6 : i32
    %71 = vector.broadcast %c6_i32 : i32 to vector<8x1xi32>
    %72 = arith.cmpi eq, %3, %71 : vector<8x1xi32>
    %cst_35 = arith.constant 0xFF800000 : f32
    %73 = vector.shape_cast %72 : vector<8x1xi1> to vector<8x1xi1>
    %74 = vector.broadcast %73 : vector<8x1xi1> to vector<8x128xi1>
    %75 = vector.broadcast %cst_35 : f32 to vector<8x128xf32>
    %76 = arith.select %74, %4, %75 : vector<8x128xi1>, vector<8x128xf32>
    %cst_36 = arith.constant dense<0xFF800000> : vector<128xf32>
    %77 = vector.multi_reduction <maximumf>, %76, %cst_36 [0] : vector<8x128xf32> to vector<128xf32>
    %78 = vector.shape_cast %77 : vector<128xf32> to vector<1x128xf32>
    %c6 = arith.constant 6 : index
    %c0_37 = arith.constant 0 : index
    %79 = vector.load %arg5[%c6, %c0_37] : memref<8x128xf32, #tpu.memory_space<vmem>>, vector<1x128xf32>
    %80 = arith.maximumf %79, %78 : vector<1x128xf32>
    %c6_38 = arith.constant 6 : index
    %c0_39 = arith.constant 0 : index
    %81 = vector.load %arg5[%c6_38, %c0_39] : memref<8x128xf32, #tpu.memory_space<vmem>>, vector<1x128xf32>
    tpu.vector_store %arg5[%c6_38, %c0_39], %80 {strides = array<i32>} : memref<8x128xf32, #tpu.memory_space<vmem>>, vector<1x128xf32>,
    %c7_i32 = arith.constant 7 : i32
    %82 = vector.broadcast %c7_i32 : i32 to vector<8x1xi32>
    %83 = arith.cmpi eq, %3, %82 : vector<8x1xi32>
    %cst_40 = arith.constant 0xFF800000 : f32
    %84 = vector.shape_cast %83 : vector<8x1xi1> to vector<8x1xi1>
    %85 = vector.broadcast %84 : vector<8x1xi1> to vector<8x128xi1>
    %86 = vector.broadcast %cst_40 : f32 to vector<8x128xf32>
    %87 = arith.select %85, %4, %86 : vector<8x128xi1>, vector<8x128xf32>
    %cst_41 = arith.constant dense<0xFF800000> : vector<128xf32>
    %88 = vector.multi_reduction <maximumf>, %87, %cst_41 [0] : vector<8x128xf32> to vector<128xf32>
    %89 = vector.shape_cast %88 : vector<128xf32> to vector<1x128xf32>
    %c7 = arith.constant 7 : index
    %c0_42 = arith.constant 0 : index
    %90 = vector.load %arg5[%c7, %c0_42] : memref<8x128xf32, #tpu.memory_space<vmem>>, vector<1x128xf32>
    %91 = arith.maximumf %90, %89 : vector<1x128xf32>
    %c7_43 = arith.constant 7 : index
    %c0_44 = arith.constant 0 : index
    %92 = vector.load %arg5[%c7_43, %c0_44] : memref<8x128xf32, #tpu.memory_space<vmem>>, vector<1x128xf32>
    tpu.vector_store %arg5[%c7_43, %c0_44], %91 {strides = array<i32>} : memref<8x128xf32, #tpu.memory_space<vmem>>, vector<1x128xf32>,
    %c0_i32_45 = arith.constant 0 : i32
    %93 = arith.cmpi eq, %arg1, %c0_i32_45 : i32
    %94 = arith.extui %93 : i1 to i32
    %c0_i32_46 = arith.constant 0 : i32
    %95 = arith.cmpi ne, %94, %c0_i32_46 : i32
    scf.if %95 {
      %c0_47 = arith.constant 0 : index
      %c0_48 = arith.constant 0 : index
      %96 = vector.load %arg5[%c0_47, %c0_48] : memref<8x128xf32, #tpu.memory_space<vmem>>, vector<8x128xf32>
      %c0_49 = arith.constant 0 : index
      %c0_50 = arith.constant 0 : index
      %97 = vector.load %arg4[%c0_49, %c0_50] : memref<8x128xf32, #tpu.memory_space<vmem>>, vector<8x128xf32>
      tpu.vector_store %arg4[%c0_49, %c0_50], %96 {strides = array<i32>} : memref<8x128xf32, #tpu.memory_space<vmem>>, vector<8x128xf32>,
    } else {
    }
    return
  }
  func.func @transform_0(%arg0: i32, %arg1: i32) -> (i32, i32) {
    %c0_i32 = arith.constant 0 : i32
    %c0_i32_0 = arith.constant 0 : i32
    return %arg1, %c0_i32 : i32, i32
  }
  func.func @transform_1(%arg0: i32, %arg1: i32) -> (i32, i32) {
    %c0_i32 = arith.constant 0 : i32
    return %arg1, %arg0 : i32, i32
  }
  func.func @transform_2(%arg0: i32, %arg1: i32) -> (i32, i32) {
    %c0_i32 = arith.constant 0 : i32
    %c0_i32_0 = arith.constant 0 : i32
    return %c0_i32, %arg0 : i32, i32
  }
}

</mosaic_0001>

<bundles_post_ra>
// kernel: tpu_custom_call.1
= control target key start
LH: loop header
LB: loop body
LE: loop exit
PB: predicated region body
PF: predicated region fallthrough
CT: control target
= control target key end

     0   :  { %s237_s0 = inlined_call_operand.vmem [shape: s32[8,1], index: 0, kind: input, shape index: {}]   ;;  %s238_s1 = inlined_call_operand.vmem [shape: f32[8,128], index: 1, kind: input, shape index: {}]   ;;  %s239_s2 = inlined_call_operand.hbm [shape: f32[8,128], index: 2, kind: output, shape index: {}]  }
   0x1   :  { %v17_v0 = vld [vmem:[%s237_s0] sm:$0xff] }
   0x2   :  { %7 = vsyncpa [#allocation4], 0  ;;  %v200_v1 = vmov 0   ;;  %vm51_vm0 = vcmp.eq.s32.totalorder %v17_v0, 2  ;;  %vm19_vm1 = vcmp.eq.s32.totalorder %v17_v0, 0  ;;  %vm83_vm2 = vcmp.eq.s32.totalorder %v17_v0, 4 }
   0x3   :  { %172 = vset.pattern.permute.xlu1 %v200_v1  ;;  %171 = vset.pattern.permute.xlu0 %v200_v1  ;;  %v52_v2 = vsel %vm51_vm0, 1, %v200_v1  ;;  %v20_v3 = vsel %vm19_vm1, 1, %v200_v1  ;;  %v84_v4 = vsel %vm83_vm2, 1, %v200_v1  ;;  %vm67_vm3 = vcmp.eq.s32.totalorder %v17_v0, 3  ;;  %v224_v12 = vld [vmem:[%s238_s1] sm:$0xff]  ;;  %s202_s1 = smov [#allocation3]  }
   0x4   :  { %173 = vset.pattern.permute.xlu2 %v200_v1  ;;  %54 = vperm.xlu1 %172, %v52_v2   ;;  %vm35_vm4 = vcmp.eq.s32.totalorder %v17_v0, 1  ;;  %vm99_vm5 = vcmp.eq.s32.totalorder %v17_v0, 5  ;;  %v68_v5 = vsel %vm67_vm3, 1, %v200_v1  ;;  %vm131_vm6 = vcmp.eq.s32.totalorder %v17_v0, 7  ;;  %s157_s12 = sshll.u32 %s202_s1, 4  ;;  %s159_s15 = sshll.u32 %s239_s2, 4  ;;  %s158_s12 = int_to_ptr.vmem [resolvable:$true] %s157_s12  ;;  %s160_s15 = int_to_ptr.hbm [resolvable:$true] %s159_s15 }
   0x5   :  { %22 = vperm.xlu0 %171, %v20_v3   ;;  %86 = vperm.xlu2 %173, %v84_v4   ;;  %v36_v6 = vsel %vm35_vm4, 1, %v200_v1  ;;  %v100_v7 = vsel %vm99_vm5, 1, %v200_v1  ;;  %vm115_vm7 = vcmp.eq.s32.totalorder %v17_v0, 6  ;;  %v132_v8 = vsel %vm131_vm6, 1, %v200_v1 }
   0x6   :  { %v116_v9 = vsel %vm115_vm7, 1, %v200_v1  ;;  %v201_v10 = vmov -inf  }
   0x7   :  { %16 = vst [vmem:[#allocation2] sm:$0xff] %v201_v10 }
   0xc   :  { %70 = vperm.xlu1 %172, %v68_v5  }
   0xd   :  { %38 = vperm.xlu0 %171, %v36_v6   ;;  %102 = vperm.xlu2 %173, %v100_v7  }
   0xe   :  { %v96_v22 = vld [vmem:[#allocation2 + $0x4] sm:$0x1]  ;;  %v112_v29 = vld [vmem:[#allocation2 + $0x5] sm:$0x1]  ;;  %v64_v52 = vld [vmem:[#allocation2 + $0x2] sm:$0x1] }
   0xf   :  { %v32_v53 = vld [vmem:[#allocation2] sm:$0x1] }
  0x14   :  { %134 = vperm.xlu1 %172, %v132_v8   ;;  %v80_v8 = vld [vmem:[#allocation2 + $0x3] sm:$0x1] }
  0x15   :  { %118 = vperm.xlu0 %171, %v116_v9   ;;  %v48_v9 = vld [vmem:[#allocation2 + $0x1] sm:$0x1] }
  0x5f   :  { %v87_v11 = vpop.permute.xlu2 %86 }
  0x60   :  { %vm88_vm8 = vcmp.eq.s32.totalorder %v87_v11, 1 }
  0x61   :  { %v89_v13 = vsel %vm88_vm8, %v224_v12, -inf }
  0x62   :  { %v90_v14 = vrot.slane %v89_v13, 4 }
  0x64   :  { %v91_v15 = vmax.f32 %v89_v13, %v90_v14 }
  0x66   :  { %v92_v16 = vrot.slane %v91_v15, 2 }
  0x67   :  { %v103_v17 = vpop.permute.xlu2 %102 }
  0x68   :  { %v93_v18 = vmax.f32 %v91_v15, %v92_v16  ;;  %vm104_vm9 = vcmp.eq.s32.totalorder %v103_v17, 1 }
  0x69   :  { %v105_v19 = vsel %vm104_vm9, %v224_v12, -inf }
  0x6a   :  { %v94_v20 = vrot.slane %v93_v18, 1  ;;  %v106_v21 = vrot.slane %v105_v19, 4 }
  0x6c   :  { %v95_v23 = vmax.f32 %v93_v18, %v94_v20  ;;  %v107_v24 = vmax.f32 %v105_v19, %v106_v21 }
  0x6e   :  { %v97_v25 = vmax.f32 %v96_v22, %v95_v23  ;;  %v108_v26 = vrot.slane %v107_v24, 2  ;;  %v144_v22 = vld [vmem:[#allocation2 + $0x7] sm:$0x1]  ;;  %v128_v23 = vld [vmem:[#allocation2 + $0x6] sm:$0x1] }
  0x70   :  { %98 = vst [vmem:[#allocation2 + $0x4] sm:$0x1] %v97_v25  ;;  %v109_v27 = vmax.f32 %v107_v24, %v108_v26 }
  0x72   :  { %v110_v28 = vrot.slane %v109_v27, 1 }
  0x74   :  { %v111_v30 = vmax.f32 %v109_v27, %v110_v28 }
  0x76   :  { %v55_v31 = vpop.permute.xlu1 %54  ;;  %v113_v33 = vmax.f32 %v112_v29, %v111_v30 }
  0x77   :  { %v23_v32 = vpop.permute.xlu0 %22  ;;  %vm56_vm10 = vcmp.eq.s32.totalorder %v55_v31, 1 }
  0x78   :  { %vm24_vm11 = vcmp.eq.s32.totalorder %v23_v32, 1  ;;  %v57_v34 = vsel %vm56_vm10, %v224_v12, -inf  ;;  %114 = vst [vmem:[#allocation2 + $0x5] sm:$0x1] %v113_v33 }
  0x79   :  { %v25_v35 = vsel %vm24_vm11, %v224_v12, -inf  ;;  %v58_v36 = vrot.slane %v57_v34, 4 }
  0x7a   :  { %v26_v37 = vrot.slane %v25_v35, 4 }
  0x7b   :  { %v59_v38 = vmax.f32 %v57_v34, %v58_v36 }
  0x7c   :  { %v27_v39 = vmax.f32 %v25_v35, %v26_v37 }
  0x7d   :  { %v60_v40 = vrot.slane %v59_v38, 2 }
  0x7e   :  { %v28_v41 = vrot.slane %v27_v39, 2  ;;  %v71_v42 = vpop.permute.xlu1 %70 }
  0x7f   :  { %v39_v43 = vpop.permute.xlu0 %38  ;;  %v61_v44 = vmax.f32 %v59_v38, %v60_v40  ;;  %vm72_vm12 = vcmp.eq.s32.totalorder %v71_v42, 1 }
  0x80   :  { %v29_v45 = vmax.f32 %v27_v39, %v28_v41  ;;  %vm40_vm13 = vcmp.eq.s32.totalorder %v39_v43, 1  ;;  %v73_v46 = vsel %vm72_vm12, %v224_v12, -inf }
  0x81   :  { %v41_v47 = vsel %vm40_vm13, %v224_v12, -inf  ;;  %v62_v48 = vrot.slane %v61_v44, 1  ;;  %v74_v50 = vrot.slane %v73_v46, 4 }
  0x82   :  { %v30_v49 = vrot.slane %v29_v45, 1  ;;  %v42_v51 = vrot.slane %v41_v47, 4 }
  0x83   :  { %v63_v54 = vmax.f32 %v61_v44, %v62_v48  ;;  %v75_v56 = vmax.f32 %v73_v46, %v74_v50 }
  0x84   :  { %v31_v55 = vmax.f32 %v29_v45, %v30_v49  ;;  %v43_v57 = vmax.f32 %v41_v47, %v42_v51 }
  0x85   :  { %v65_v58 = vmax.f32 %v64_v52, %v63_v54  ;;  %v76_v60 = vrot.slane %v75_v56, 2 }
  0x86   :  { %v33_v59 = vmax.f32 %v32_v53, %v31_v55  ;;  %v44_v61 = vrot.slane %v43_v57, 2  ;;  %v135_v62 = vpop.permute.xlu1 %134 }
  0x87   :  { %v119_v63 = vpop.permute.xlu0 %118  ;;  %66 = vst [vmem:[#allocation2 + $0x2] sm:$0x1] %v65_v58  ;;  %v77_v0 = vmax.f32 %v75_v56, %v76_v60  ;;  %vm136_vm14 = vcmp.eq.s32.totalorder %v135_v62, 1 }
  0x88   :  { %v45_v1 = vmax.f32 %v43_v57, %v44_v61  ;;  %vm120_vm15 = vcmp.eq.s32.totalorder %v119_v63, 1  ;;  %34 = vst [vmem:[#allocation2] sm:$0x1] %v33_v59  ;;  %v137_v2 = vsel %vm136_vm14, %v224_v12, -inf }
  0x89   :  { %v121_v3 = vsel %vm120_vm15, %v224_v12, -inf  ;;  %v78_v4 = vrot.slane %v77_v0, 1  ;;  %v138_v6 = vrot.slane %v137_v2, 4 }
  0x8a   :  { %v46_v5 = vrot.slane %v45_v1, 1  ;;  %v122_v7 = vrot.slane %v121_v3, 4 }
  0x8b   :  { %v79_v10 = vmax.f32 %v77_v0, %v78_v4  ;;  %v139_v13 = vmax.f32 %v137_v2, %v138_v6 }
  0x8c   :  { %v47_v11 = vmax.f32 %v45_v1, %v46_v5  ;;  %v123_v14 = vmax.f32 %v121_v3, %v122_v7 }
  0x8d   :  { %v81_v15 = vmax.f32 %v80_v8, %v79_v10  ;;  %v140_v17 = vrot.slane %v139_v13, 2 }
  0x8e   :  { %v49_v16 = vmax.f32 %v48_v9, %v47_v11  ;;  %v124_v18 = vrot.slane %v123_v14, 2 }
  0x8f   :  { %82 = vst [vmem:[#allocation2 + $0x3] sm:$0x1] %v81_v15  ;;  %v141_v19 = vmax.f32 %v139_v13, %v140_v17 }
  0x90   :  { %v125_v20 = vmax.f32 %v123_v14, %v124_v18  ;;  %50 = vst [vmem:[#allocation2 + $0x1] sm:$0x1] %v49_v16 }
  0x91   :  { %v142_v21 = vrot.slane %v141_v19, 1 }
  0x92   :  { %v126_v12 = vrot.slane %v125_v20, 1 }
  0x93   :  { %v143_v24 = vmax.f32 %v141_v19, %v142_v21 }
  0x94   :  { %v127_v25 = vmax.f32 %v125_v20, %v126_v12 }
  0x95   :  { %v145_v26 = vmax.f32 %v144_v22, %v143_v24 }
  0x96   :  { %v129_v27 = vmax.f32 %v128_v23, %v127_v25 }
  0x97   :  { %146 = vst [vmem:[#allocation2 + $0x7] sm:$0x1] %v145_v26 }
  0x98   :  { %130 = vst [vmem:[#allocation2 + $0x6] sm:$0x1] %v129_v27 }
  0x9f   :  { %v150_v28 = vld [vmem:[#allocation2] sm:$0xff] }
  0xa0   :  { %151 = vst [vmem:[#allocation3] sm:$0xff] %v150_v28 }
  0xa1   :  { %162 = dma.vmem_to_hbm [thread:$0]  %s158_s12, 128, %s160_s15, [#allocation4]  }
  0xa2   :  { %198 = dma.done.wait [#allocation4], 128  }
  0xa3   :  { %199 = vsyncadd [#allocation4], 4294967168 }
  0xa4   :  { %167 = vsyncpa [#allocation4], 1 }

</bundles_post_ra>
